<compile_context>
chip_gen: v5e
topology: v5e:2x2
jax: 0.10.0
libtpu: 0.0.40
codegen_flags: <defaults>
</compile_context>

<pallas_src>
import numpy as np
import jax
import jax.numpy as jnp
from jax import lax
from jax.experimental import pallas as pl
from jax.experimental.pallas import tpu as pltpu


FPAD = 8  # padded augmented-feature width: [x, y, r, g, b] + 2 aug terms + pad


# ------------------------------------------------------------------ #
# Pallas kernel: one packed (i, j>=i) tile pair per grid step         #
#   S_ij = sum_{p in tile i, q in tile j} W_pq * <seg_p, seg_q>       #
#   off-diagonal pairs are doubled (W and the correlation are         #
#   symmetric in (p, q)).                                             #
# ------------------------------------------------------------------ #
def _make_crf_kernel(w_dtype):
    def _crf_energy_kernel(pi_ref, pj_ref, fa_ref, fbt_ref, si_ref, sj_ref,
                           out_ref):
        p = pl.program_id(0)          # packed pair index

        fa = fa_ref[0]                # (TP, FPAD)  [f, ||f||^2, 1, 0...]
        fbt = fbt_ref[0]              # (FPAD, TP)  [f, -1/2, -||f||^2/2, 0...]^T
        si = si_ref[0]                # (K, TP)  classes x pixels (tile i)
        sj = sj_ref[0]                # (K, TP)  classes x pixels (tile j)

        # One MXU pass gives  -0.5 * ||f_p - f_q||^2  directly.
        # HIGHEST precision: nearby pixels have d2 ~ 0 and the expression is
        # cancellation-sensitive.  (Mosaic only supports DEFAULT/HIGHEST
        # contract precision, so the suggested HIGH/bf16_3x is unavailable;
        # contraction dim is only 8, so this is not the bottleneck anyway.)
        nhd2 = lax.dot_general(fa, fbt, (((1,), (0,)), ((), ())),
                               preferred_element_type=jnp.float32,
                               precision=lax.Precision.HIGHEST)     # (TP, TP)

        # W = exp(-0.5*d2); bf16 on v6e/v7x (EUP-bound), f32 on v5e.
        w = jnp.exp(jnp.minimum(nhd2, 0.0).astype(w_dtype))          # (TP, TP)

        # sum_{p,q} W_pq <s_p, s_q>  ==  sum( sj * (si @ W) )
        # Lane-dense (K, TP) result; DEFAULT MXU precision (probs in [0,1]).
        tmp = lax.dot_general(si.astype(w_dtype), w,
                              (((1,), (0,)), ((), ())),
                              preferred_element_type=jnp.float32)    # (K, TP)
        e = jnp.sum(sj * tmp)

        # strict upper-triangle tile pairs are counted twice
        scale = jnp.where(pi_ref[p] == pj_ref[p], 1.0, 2.0).astype(jnp.float32)
        out_ref[...] = jnp.broadcast_to(scale * e, out_ref.shape)

    return _crf_energy_kernel


def crf_energy_pallas(feat_a, feat_bt, segs, *, tile_p=None,
                      band_rows=None, spatial_ws=None):
    """feat_a: (N, P, FPAD) f32, feat_bt: (N, FPAD, P) f32 (fa . fb = -0.5*d2),
    segs: (N, K, P) f32.
    Returns scalar  sum_n sum_{p,q} exp(-0.5*d2_pq) * <seg_p, seg_q>."""
    N, P, _ = feat_a.shape
    K = segs.shape[1]

    # Big tiles amortize the ~0.35us per-grid-step overhead; TP=1024 keeps the
    # (TP,TP) intermediate at 4 MiB f32 / 2 MiB bf16 -- safe on v5e/v6e
    # (128 MiB VMEM) and v7x (64 MiB).  Small problems fall back to one
    # 128-multiple tile.
    if tile_p is None:
        tile_p = 1024
    TP = min(tile_p, ((P + 127) // 128) * 128)
    TP = max(TP, 128)
    P_pad = ((P + TP - 1) // TP) * TP
    if P_pad != P:
        feat_a = jnp.pad(feat_a, ((0, 0), (0, P_pad - P), (0, 0)))
        feat_bt = jnp.pad(feat_bt, ((0, 0), (0, 0), (0, P_pad - P)))
        segs = jnp.pad(segs, ((0, 0), (0, 0), (0, P_pad - P)))  # zero rows -> 0
    NT = P_pad // TP

    # Packed upper triangle: only (i, j) pairs with j >= i reach the kernel
    # (no wasted DMA / grid steps on the lower triangle).  Optional spatial
    # band pruning drops tile pairs whose minimum row separation exceeds
    # band_rows (a controlled approximation; off by default).
    pair_i, pair_j = [], []
    for i in range(NT):
        for j in range(i, NT):
            if band_rows is not None and spatial_ws is not None and j > i:
                min_sep_rows = max(0, ((j - i) * TP - (TP - 1)) // spatial_ws - 1)
                if min_sep_rows > band_rows:
                    continue  # truncates a negligible Gaussian tail
            pair_i.append(i)
            pair_j.append(j)
    num_pairs = len(pair_i)
    pair_i = jnp.asarray(pair_i, dtype=jnp.int32)
    pair_j = jnp.asarray(pair_j, dtype=jnp.int32)

    # bf16 W on chips with bf16 VPU/EUP (v6e / v7x); f32 elsewhere (v5e, ...).
    w_dtype = jnp.float32
    try:
        kind = jax.devices()[0].device_kind.lower()
        if ("v6" in kind) or ("v7" in kind) or ("tpu7" in kind):
            w_dtype = jnp.bfloat16
    except Exception:
        pass

    grid = (num_pairs, N)
    grid_spec = pltpu.PrefetchScalarGridSpec(
        num_scalar_prefetch=2,
        grid=grid,
        in_specs=[
            # index_maps receive (grid idx..., *prefetch refs)
            pl.BlockSpec((1, TP, FPAD), lambda p, n, pi, pj: (n, pi[p], 0)),
            pl.BlockSpec((1, FPAD, TP), lambda p, n, pi, pj: (n, 0, pj[p])),
            pl.BlockSpec((1, K, TP),    lambda p, n, pi, pj: (n, 0, pi[p])),
            pl.BlockSpec((1, K, TP),    lambda p, n, pi, pj: (n, 0, pj[p])),
        ],
        # every (pair, batch) step owns a distinct lane-dense (8,128) block
        out_specs=pl.BlockSpec((1, 1, 8, 128), lambda p, n, pi, pj: (p, n, 0, 0)),
    )
    partials = pl.pallas_call(
        _make_crf_kernel(w_dtype),
        out_shape=jax.ShapeDtypeStruct((num_pairs, N, 8, 128), jnp.float32),
        grid_spec=grid_spec,
        compiler_params=pltpu.CompilerParams(
            # all steps are independent -> both axes shardable across TCs
            dimension_semantics=("parallel", "parallel"),
            vmem_limit_bytes=48 * 1024 * 1024),
    )(pair_i, pair_j, feat_a, feat_bt, segs, segs)
    return jnp.sum(partials[:, :, 0, 0])


# ------------------------------------------------------------------ #
# Plain-JAX glue: PyTorch-style interpolation + feature construction  #
# ------------------------------------------------------------------ #
def _interp_nearest(x, out_h, out_w):
    """F.interpolate(mode='nearest') for NCHW."""
    in_h, in_w = x.shape[-2:]
    hs = jnp.minimum(jnp.floor(jnp.arange(out_h) * (in_h / out_h)).astype(jnp.int32), in_h - 1)
    ws = jnp.minimum(jnp.floor(jnp.arange(out_w) * (in_w / out_w)).astype(jnp.int32), in_w - 1)
    return x[..., hs, :][..., :, ws]


def _interp_bilinear(x, out_h, out_w):
    """F.interpolate(mode='bilinear', align_corners=False) for NCHW."""
    in_h, in_w = x.shape[-2:]

    def src_coords(out_sz, in_sz):
        s = (jnp.arange(out_sz) + 0.5) * (in_sz / out_sz) - 0.5
        s = jnp.maximum(s, 0.0)
        i0 = jnp.floor(s).astype(jnp.int32)
        i0 = jnp.minimum(i0, in_sz - 1)
        i1 = jnp.minimum(i0 + 1, in_sz - 1)
        frac = s - i0.astype(s.dtype)
        return i0, i1, frac

    y0, y1, fy = src_coords(out_h, in_h)
    x0, x1, fx = src_coords(out_w, in_w)

    top = x[..., y0, :]
    bot = x[..., y1, :]
    row = top * (1.0 - fy)[:, None] + bot * fy[:, None]
    left = row[..., x0]
    right = row[..., x1]
    return left * (1.0 - fx) + right * fx


def _build_features(img_s, sigma_rgb, sxy):
    """img_s: (N,C,Hs,Ws). Returns plain (N,P,C+2) features f."""
    N, C, Hs, Ws = img_s.shape
    P = Hs * Ws
    yy, xx = jnp.meshgrid(jnp.arange(Hs, dtype=jnp.float32),
                          jnp.arange(Ws, dtype=jnp.float32), indexing="ij")
    pos = jnp.stack([xx.reshape(-1) / sxy, yy.reshape(-1) / sxy], axis=-1)   # (P,2)
    pos = jnp.broadcast_to(pos[None], (N, P, 2))
    rgb = img_s.reshape(N, C, P).transpose(0, 2, 1) / sigma_rgb              # (N,P,C)
    return jnp.concatenate([pos, rgb], axis=-1).astype(jnp.float32)          # (N,P,C+2)


def dense_crf_loss(images, segmentations, rois, *, weight, sigma_rgb,
                   sigma_xy, scale_factor, tile_p=None, prune_sigma=None):
    """images (N,3,H,W) f32, segmentations (N,K,H,W) f32, rois (N,H,W) f32.
    Returns shape-(1,) loss, matching DenseCRFLoss.forward."""
    N, C, H, W = images.shape
    _, K, _, _ = segmentations.shape
    Hs, Ws = int(H * scale_factor), int(W * scale_factor)

    img_s = _interp_nearest(images, Hs, Ws)                               # (N,3,Hs,Ws)
    seg_s = _interp_bilinear(segmentations, Hs, Ws)                       # (N,K,Hs,Ws)
    roi_s = _interp_nearest(rois[:, None, :, :], Hs, Ws)[:, 0]            # (N,Hs,Ws)
    seg_s = seg_s * roi_s[:, None, :, :]                                  # seg * ROI

    sxy = sigma_xy * scale_factor
    P = Hs * Ws

    f = _build_features(img_s, sigma_rgb, sxy)                            # (N,P,5)
    sq = jnp.sum(f * f, axis=-1, keepdims=True)                           # (N,P,1)
    one = jnp.ones_like(sq)
    npad = FPAD - (f.shape[-1] + 2)
    zpad = jnp.zeros((N, P, npad), jnp.float32)
    # fa . fb = f_p.f_q - 0.5||f_p||^2 - 0.5||f_q||^2 = -0.5 * d2_pq
    feat_a = jnp.concatenate([f, sq, one, zpad], axis=-1)                 # (N,P,8)
    feat_b = jnp.concatenate([f, -0.5 * one, -0.5 * sq, zpad], axis=-1)   # (N,P,8)
    feat_bt = jnp.transpose(feat_b, (0, 2, 1))                            # (N,8,P) lane-dense

    seg_flat = seg_s.reshape(N, K, P).astype(jnp.float32)                 # (N,K,P) no transpose

    band_rows = None
    if prune_sigma is not None:
        band_rows = int(np.ceil(prune_sigma * sxy))

    energy = crf_energy_pallas(feat_a, feat_bt, seg_flat, tile_p=tile_p,
                               band_rows=band_rows, spatial_ws=Ws)
    loss = weight * (-energy / N)
    # TODO(synk): backward pass (grad wrt segmentations = -2*AS*ROI/N) not implemented.
    return loss.reshape(1)


# ------------------------------------------------------------------ #
# Pure-JAX reference (brute force) for sanity check                   #
# ------------------------------------------------------------------ #
def _reference_energy(feat, seg):
    d2 = jnp.sum((feat[:, :, None, :] - feat[:, None, :, :]) ** 2, axis=-1)
    w = jnp.exp(-0.5 * d2)
    corr = jnp.einsum("npk,nqk->npq", seg, seg)
    return jnp.sum(w * corr)


if __name__ == "__main__":
    key = jax.random.PRNGKey(0)
    weight, sigma_rgb, sigma_xy, scale_factor = 2e-9, 15.0, 80.0, 0.5

    def run_case(N, C, K, H, W, tile_p):
        k1, k2, k3 = jax.random.split(jax.random.fold_in(key, H), 3)
        images = jax.random.uniform(k1, (N, C, H, W), jnp.float32) * 255.0
        logits = jax.random.normal(k2, (N, K, H, W), jnp.float32)
        segmentations = jax.nn.softmax(logits, axis=1)
        rois = (jax.random.uniform(k3, (N, H, W), jnp.float32) > 0.3).astype(jnp.float32)

        loss = dense_crf_loss(images, segmentations, rois,
                              weight=weight, sigma_rgb=sigma_rgb,
                              sigma_xy=sigma_xy, scale_factor=scale_factor,
                              tile_p=tile_p)
        loss = jax.block_until_ready(loss)

        # dense pure-JAX reference
        Hs, Ws = int(H * scale_factor), int(W * scale_factor)
        img_s = _interp_nearest(images, Hs, Ws)
        seg_s = _interp_bilinear(segmentations, Hs, Ws)
        roi_s = _interp_nearest(rois[:, None], Hs, Ws)[:, 0]
        seg_s = seg_s * roi_s[:, None]
        P = Hs * Ws
        feat = _build_features(img_s, sigma_rgb, sigma_xy * scale_factor)
        seg_ref = seg_s.reshape(N, K, P).transpose(0, 2, 1)
        ref = weight * (-_reference_energy(feat, seg_ref) / N)
        np.testing.assert_allclose(np.asarray(loss[0]), np.asarray(ref),
                                   rtol=1e-2, atol=1e-12)

    # case 1: spec-suggested small shapes (single tile pair)
    run_case(N=2, C=3, K=4, H=16, W=16, tile_p=None)
    # case 2: forces NT=2 tiles -> packed upper-triangle pairs + off-diag doubling
    run_case(N=2, C=3, K=4, H=32, W=32, tile_p=128)

    print("KERNEL_OK")
</pallas_src>

<mosaic_0001>
module attributes {stable_mosaic.version = 11 : i64} {
  func.func @_crf_energy_kernel(%arg0: i32, %arg1: i32, %arg2: memref<1xi32, #tpu.memory_space<smem>>, %arg3: memref<1xi32, #tpu.memory_space<smem>>, %arg4: memref<1x128x8xf32, #tpu.memory_space<vmem>>, %arg5: memref<1x8x128xf32, #tpu.memory_space<vmem>>, %arg6: memref<1x4x128xf32, #tpu.memory_space<vmem>>, %arg7: memref<1x4x128xf32, #tpu.memory_space<vmem>>, %arg8: memref<1x1x8x128xf32, #tpu.memory_space<vmem>>) attributes {dimension_semantics = [#tpu.dimension_semantics<parallel>, #tpu.dimension_semantics<parallel>], iteration_bounds = array<i64: 1, 2>, scalar_prefetch = 2 : i64, scratch_operands = 0 : i64, tpu.core_type = #tpu.core_type<tc>, window_params = [{transform_indices = @transform_0, window_bounds = array<i64: 1, 128, 8>}, {transform_indices = @transform_1, window_bounds = array<i64: 1, 8, 128>}, {transform_indices = @transform_2, window_bounds = array<i64: 1, 4, 128>}, {transform_indices = @transform_3, window_bounds = array<i64: 1, 4, 128>}, {transform_indices = @transform_4, window_bounds = array<i64: 1, 1, 8, 128>}]} {
    %c0 = arith.constant 0 : index
    %c0_0 = arith.constant 0 : index
    %c0_1 = arith.constant 0 : index
    %0 = vector.load %arg4[%c0, %c0_0, %c0_1] : memref<1x128x8xf32, #tpu.memory_space<vmem>>, vector<1x128x8xf32>
    %1 = vector.shape_cast %0 : vector<1x128x8xf32> to vector<128x8xf32>
    %c0_2 = arith.constant 0 : index
    %c0_3 = arith.constant 0 : index
    %c0_4 = arith.constant 0 : index
    %2 = vector.load %arg5[%c0_2, %c0_3, %c0_4] : memref<1x8x128xf32, #tpu.memory_space<vmem>>, vector<1x8x128xf32>
    %3 = vector.shape_cast %2 : vector<1x8x128xf32> to vector<8x128xf32>
    %c0_5 = arith.constant 0 : index
    %c0_6 = arith.constant 0 : index
    %c0_7 = arith.constant 0 : index
    %4 = vector.load %arg6[%c0_5, %c0_6, %c0_7] : memref<1x4x128xf32, #tpu.memory_space<vmem>>, vector<1x4x128xf32>
    %5 = vector.shape_cast %4 : vector<1x4x128xf32> to vector<4x128xf32>
    %c0_8 = arith.constant 0 : index
    %c0_9 = arith.constant 0 : index
    %c0_10 = arith.constant 0 : index
    %6 = vector.load %arg7[%c0_8, %c0_9, %c0_10] : memref<1x4x128xf32, #tpu.memory_space<vmem>>, vector<1x4x128xf32>
    %7 = vector.shape_cast %6 : vector<1x4x128xf32> to vector<4x128xf32>
    %cst = arith.constant dense<0.000000e+00> : vector<128x128xf32>
    %8 = tpu.matmul %1, %3, %cst {dimension_numbers = #tpu.dot_dimension_numbers<[1], [0], [0], [1], [0, 0, 1, 1], [], []>, precision = #tpu.contract_precision<fp32>} : vector<128x8xf32>, vector<8x128xf32>, vector<128x128xf32> -> vector<128x128xf32>
    %cst_11 = arith.constant 0.000000e+00 : f32
    %9 = vector.broadcast %cst_11 : f32 to vector<128x128xf32>
    %10 = arith.minimumf %8, %9 : vector<128x128xf32>
    %11 = math.exp %10 : vector<128x128xf32>
    %cst_12 = arith.constant dense<0.000000e+00> : vector<4x128xf32>
    %12 = tpu.matmul %5, %11, %cst_12 {dimension_numbers = #tpu.dot_dimension_numbers<[1], [0], [0], [1], [0, 0, 1, 1], [], []>} : vector<4x128xf32>, vector<128x128xf32>, vector<4x128xf32> -> vector<4x128xf32>
    %13 = arith.mulf %7, %12 : vector<4x128xf32>
    %14 = vector.shape_cast %13 : vector<4x128xf32> to vector<1x4x128xf32>
    %cst_13 = arith.constant dense<0.000000e+00> : vector<1xf32>
    %15 = vector.multi_reduction <add>, %14, %cst_13 [1, 2] : vector<1x4x128xf32> to vector<1xf32>
    %16 = vector.shape_cast %15 : vector<1xf32> to vector<1x1x1xf32>
    %17 = vector.extract %16[0, 0, 0] : f32 from vector<1x1x1xf32>
    %18 = arith.index_cast %arg0 : i32 to index
    %19 = memref.load %arg2[%18] : memref<1xi32, #tpu.memory_space<smem>>
    %20 = arith.index_cast %arg0 : i32 to index
    %21 = memref.load %arg3[%20] : memref<1xi32, #tpu.memory_space<smem>>
    %22 = arith.cmpi eq, %19, %21 : i32
    %cst_14 = arith.constant 1.000000e+00 : f32
    %cst_15 = arith.constant 2.000000e+00 : f32
    %23 = arith.select %22, %cst_14, %cst_15 : f32
    %24 = arith.mulf %23, %17 : f32
    %25 = vector.broadcast %24 : f32 to vector<1x1x8x128xf32>
    %c0_16 = arith.constant 0 : index
    %c0_17 = arith.constant 0 : index
    %c0_18 = arith.constant 0 : index
    %c0_19 = arith.constant 0 : index
    %26 = vector.load %arg8[%c0_16, %c0_17, %c0_18, %c0_19] : memref<1x1x8x128xf32, #tpu.memory_space<vmem>>, vector<1x1x8x128xf32>
    tpu.vector_store %arg8[%c0_16, %c0_17, %c0_18, %c0_19], %25 {strides = array<i32>} : memref<1x1x8x128xf32, #tpu.memory_space<vmem>>, vector<1x1x8x128xf32>,
    return
  }
  func.func @transform_0(%arg0: i32, %arg1: i32, %arg2: memref<1xi32, #tpu.memory_space<smem>>, %arg3: memref<1xi32, #tpu.memory_space<smem>>) -> (i32, i32, i32) {
    %0 = arith.index_cast %arg0 : i32 to index
    %1 = memref.load %arg2[%0] : memref<1xi32, #tpu.memory_space<smem>>
    %c0_i32 = arith.constant 0 : i32
    %c0_i32_0 = arith.constant 0 : i32
    return %arg1, %1, %c0_i32 : i32, i32, i32
  }
  func.func @transform_1(%arg0: i32, %arg1: i32, %arg2: memref<1xi32, #tpu.memory_space<smem>>, %arg3: memref<1xi32, #tpu.memory_space<smem>>) -> (i32, i32, i32) {
    %0 = arith.index_cast %arg0 : i32 to index
    %1 = memref.load %arg3[%0] : memref<1xi32, #tpu.memory_space<smem>>
    %c0_i32 = arith.constant 0 : i32
    %c0_i32_0 = arith.constant 0 : i32
    return %arg1, %c0_i32, %1 : i32, i32, i32
  }
  func.func @transform_2(%arg0: i32, %arg1: i32, %arg2: memref<1xi32, #tpu.memory_space<smem>>, %arg3: memref<1xi32, #tpu.memory_space<smem>>) -> (i32, i32, i32) {
    %0 = arith.index_cast %arg0 : i32 to index
    %1 = memref.load %arg2[%0] : memref<1xi32, #tpu.memory_space<smem>>
    %c0_i32 = arith.constant 0 : i32
    %c0_i32_0 = arith.constant 0 : i32
    return %arg1, %c0_i32, %1 : i32, i32, i32
  }
  func.func @transform_3(%arg0: i32, %arg1: i32, %arg2: memref<1xi32, #tpu.memory_space<smem>>, %arg3: memref<1xi32, #tpu.memory_space<smem>>) -> (i32, i32, i32) {
    %0 = arith.index_cast %arg0 : i32 to index
    %1 = memref.load %arg3[%0] : memref<1xi32, #tpu.memory_space<smem>>
    %c0_i32 = arith.constant 0 : i32
    %c0_i32_0 = arith.constant 0 : i32
    return %arg1, %c0_i32, %1 : i32, i32, i32
  }
  func.func @transform_4(%arg0: i32, %arg1: i32, %arg2: memref<1xi32, #tpu.memory_space<smem>>, %arg3: memref<1xi32, #tpu.memory_space<smem>>) -> (i32, i32, i32, i32) {
    %c0_i32 = arith.constant 0 : i32
    %c0_i32_0 = arith.constant 0 : i32
    %c0_i32_1 = arith.constant 0 : i32
    return %arg0, %arg1, %c0_i32, %c0_i32_0 : i32, i32, i32, i32
  }
}

</mosaic_0001>

<bundles_post_ra>
// kernel: tpu_custom_call.1
= control target key start
LH: loop header
LB: loop body
LE: loop exit
PB: predicated region body
PF: predicated region fallthrough
CT: control target
= control target key end

     0   :  { %s1909_s0 = inlined_call_operand.<no memory space> [shape: s32[1], index: 0, kind: input, shape index: {}]   ;;  %s1910_s1 = inlined_call_operand.<no memory space> [shape: s32[1], index: 1, kind: input, shape index: {}]   ;;  %s1911_s2 = inlined_call_operand.vmem [shape: f32[2,128,8], index: 2, kind: input, shape index: {}]   ;;  %s1912_s3 = inlined_call_operand.vmem [shape: f32[2,8,128], index: 3, kind: input, shape index: {}]   ;;  %s1913_s4 = inlined_call_operand.vmem [shape: f32[2,4,128], index: 4, kind: input, shape index: {}]   ;;  %s1914_s5 = inlined_call_operand.vmem [shape: f32[2,4,128], index: 5, kind: input, shape index: {}]   ;;  %s1915_s6 = inlined_call_operand.hbm [shape: f32[1,2,8,128], index: 6, kind: output, shape index: {}]  }
   0x1   :  { %11 = sst [smem:[#allocation3]] %s1909_s0 }
   0x2   :  { %12 = sst [smem:[#allocation4]] %s1910_s1 }
   0x3   :  { %13 = vsyncpa [#allocation6], 0 }
   0x4   :  { %15 = vsyncpa [#allocation6 + $0x1], 0  ;;  %s1474_s25 = smov 0   ;;  %s1476_s26 = smov 0  }
   0x5   :  { %s1478_s27 = smov 0   ;;  %s1480_s28 = smov 0  }
   0x6   :  { %s1482_s29 = smov 0   ;;  %s1484_s30 = smov 0  }
   0x7 LB: > { %s1246_s0 = sadd.s32 4294967295, %s1431_s30   ;;  %s1247_s1 = sadd.s32 4294967294, %s1431_s30   ;;  %s1431_s30 = sphi %s1484_s30, %s21_s30   ;;  %s1427_s29 = sphi %s1482_s29, %s1922_s29   ;;  %s1423_s28 = sphi %s1480_s28, %s1921_s28   ;;  %s1419_s27 = sphi %s1478_s27, %s1920_s27   ;;  %s1415_s26 = sphi %s1476_s26, %s1919_s26   ;;  %s1411_s25 = sphi %s1474_s25, %s1918_s25  }
   0x8   : > { %s30_s7 = sadd.s32 1, %s1427_s29  ;;  %s162_s8 = sadd.s32 1, %s1419_s27 }
   0x9   : > { %p31_p0 = scmp.ge.s32.totalorder %s30_s7, 2  ;;  %p172_p1 = scmp.ne.s32.totalorder %s1419_s27, %s1415_s26 }
   0xa   : > { %p173_p2 = scmp.eq.s32.totalorder %s1246_s0, 1  ;;  %p178_p3 = scmp.ne.s32.totalorder %s1415_s26, %s1411_s25 }
   0xb   : > { %s1924_s7 = smov (%p31_p0, %s30_s7), 0  ;;  %p179_p5 = scmp.eq.s32.totalorder %s1247_s1, 1 }
   0xc   : > { %p1514_p4 = por %p173_p2, %p172_p1  ;;  %s158_s10 = ssub.s32 %s1427_s29, %s1924_s7 }
   0xd   : > { %p1250_p6 = scmp.ge.s32.totalorder %s1431_s30, 1  ;;  %p160_p7 = scmp.eq.s32.totalorder %s158_s10, 0 }
   0xe   : > { %p1521_p8 = por %p179_p5, %p178_p3  ;;  %p248_p9 = scmp.lt.s32.totalorder %s1431_s30, 3 }
   0xf   : > { %s1527_s12 = scalar_select %p160_p7, %s1419_s27, %s162_s8  }
  0x10   : > { %p249_p10 = pnand %p1250_p6, %p248_p9 }
  0x11   : > { %s1529_s13 = sld [smem:[#allocation3]] (!%p249_p10)  ;;  %p305_p11 = scmp.lt.s32.totalorder (!%p249_p10), %s1423_s28, 1 }
  0x12   : > { %252 = sbr.rel (%p249_p10) target bundleno = 727 (0x2d7), region = 36  ;;  %s1532_s14 = sld [smem:[#allocation4]] (!%p249_p10) }
  0x13   : > { %s1259_s8 = sshll.u32 (!%p249_p10), %s1423_s28, 3 }
  0x17   : > { %s1535_s15 = scalar_select %p305_p11, %s1423_s28, 1  ;;  %vm361_vm0 = vcmask 64512   ;;  %vm1090_vm1 = vcmask 1043456  }
  0x18   : > { %s1252_s16 = sshll.u32 %s1529_s13, 4  ;;  %p318_p13 = scmp.lt.s32.totalorder %s1532_s14, 0 }
  0x19   : > { %p307_p12 = scmp.lt.s32.totalorder %s1252_s16, 15  ;;  %s1253_s17 = sshll.u32 %s1535_s15, 4 }
  0x1a   : > { %s319_s18 = scalar_select %p318_p13, %s1532_s14, 0 }
  0x1b   : > { %s1926_s16 = smov (!%p307_p12, %s1252_s16), 15  ;;  %p327_p0 = scmp.lt.s32.totalorder %s1529_s13, 0 }
  0x1c   : > { %s310_s19 = sadd.s32 %s1253_s17, %s1926_s16  ;;  %s1542_s21 = sadd.s32 %s319_s18, %s1535_s15 }
  0x1d   : > { %s1254_s20 = sshll.u32 %s310_s19, 3  ;;  %s1255_s0 = sshll.u32 %s1542_s21, 3 }
  0x1e   : > { %s1547_s24 = scalar_lea.vmem %s1911_s2, %s1254_s20  ;;  %s322_s10 = scalar_lea.vmem %s1912_s3, %s1255_s0 }
  0x1f   : > { %v351_v0 = vld [vmem:[%s1547_s24 + $0x48] sm:$0xff]  ;;  %v342_v1 = vld [vmem:[%s1547_s24] sm:$0xff]  ;;  %v352_v2 = vld [vmem:[%s1547_s24 + $0x50] sm:$0xff]  ;;  %s328_s16 = scalar_select %p327_p0, %s1529_s13, 0 }
  0x20   : > { %v358_v3 = vld [vmem:[%s322_s10] sm:$0xff]  ;;  %v390_v4 = vsel %vm361_vm0, %v351_v0, 0  ;;  %v363_v5 = vsel %vm361_vm0, %v342_v1, 0  ;;  %v393_v6 = vsel %vm361_vm0, %v352_v2, 0  ;;  %v343_v7 = vld [vmem:[%s1547_s24 + $0x8] sm:$0xff]  ;;  %v353_v12 = vld [vmem:[%s1547_s24 + $0x58] sm:$0xff]  ;;  %p1103_p1 = scmp.eq.s32.totalorder %s1529_s13, %s1532_s14 }
  0x21   : > { %v425_v8 = vand.u32 4294901760, %v358_v3  ;;  %v1560_v9 = vand.u32 4294901760, %v390_v4  ;;  %v1562_v10 = vand.u32 4294901760, %v363_v5  ;;  %v1564_v11 = vand.u32 4294901760, %v393_v6  ;;  %v344_v13 = vld [vmem:[%s1547_s24 + $0x10] sm:$0xff]  ;;  %v345_v36 = vld [vmem:[%s1547_s24 + $0x18] sm:$0xff]  ;;  %s329_s17 = sadd.s32 %s328_s16, %s1535_s15 }
  0x22   : > { %v366_v14 = vsel %vm361_vm0, %v343_v7, 0  ;;  %v396_v20 = vsel %vm361_vm0, %v353_v12, 0  ;;  %v369_v21 = vsel %vm361_vm0, %v344_v13, 0  ;;  %v354_v37 = vld [vmem:[%s1547_s24 + $0x60] sm:$0xff]  ;;  %v372_v42 = vsel %vm361_vm0, %v345_v36, 0  ;;  %v355_v51 = vld [vmem:[%s1547_s24 + $0x68] sm:$0xff] }
  0x23   : > { %v572_v15 = vsub.f32 %v358_v3, %v425_v8  ;;  %426 = vmatpush.msra.mxu0 %v425_v8  ;;  %1262 = vmatpush.msra.mxu3 %v425_v8  ;;  %v1570_v16 = vsub.f32 %v363_v5, %v1562_v10  ;;  %v1573_v17 = vsub.f32 %v390_v4, %v1560_v9  ;;  %v1575_v18 = vand.u32 4294901760, %v366_v14  ;;  %v346_v50 = vld [vmem:[%s1547_s24 + $0x20] sm:$0xff]  ;;  %v347_v0 = vld [vmem:[%s1547_s24 + $0x28] sm:$0xff]  ;;  %v356_v1 = vld [vmem:[%s1547_s24 + $0x70] sm:$0xff]  ;;  %s1256_s18 = sshll.u32 %s329_s17, 2  ;;  %s1257_s15 = sshll.u32 %s1542_s21, 2 }
  0x24   : > { %v1578_v19 = vsub.f32 %v393_v6, %v1564_v11  ;;  %v1594_v30 = vand.u32 4294901760, %v396_v20  ;;  %v1596_v31 = vand.u32 4294901760, %v369_v21  ;;  %v399_v43 = vsel %vm361_vm0, %v354_v37, 0  ;;  %s331_s22 = scalar_lea.vmem %s1913_s4, %s1256_s18  ;;  %s340_s0 = scalar_lea.vmem %s1914_s5, %s1257_s15 }
  0x25   : > { %757 = vmatpush.msrb.mxu3 %v425_v8  ;;  %v573_v22 = vand.u32 4294901760, %v572_v15  ;;  %v429_v23 = vand.u32 4294901760, %v1570_v16  ;;  %v501_v24 = vand.u32 4294901760, %v1573_v17  ;;  %v1585_v25 = vsub.f32 %v366_v14, %v1575_v18  ;;  %s300_s21 = sand.u32 1, %s1415_s26   ;;  %s1121_s17 = scalar_lea.hbm %s1915_s6, %s1259_s8 }
  0x26   : > { %v509_v35 = vand.u32 4294901760, %v1578_v19  ;;  %v1606_v39 = vsub.f32 %v369_v21, %v1596_v31  ;;  %v1613_v41 = vsub.f32 %v396_v20, %v1594_v30  ;;  %v1618_v46 = vand.u32 4294901760, %v372_v42  ;;  %v350_v21 = vld [vmem:[%s1547_s24 + $0x40] sm:$0xff]  ;;  %s1251_s1 = sshll.u32 %s300_s21, 3 }
  0x27   : > { %v574_v26 = vsub.f32 %v572_v15, %v573_v22  ;;  %v430_v27 = vsub.f32 %v1570_v16, %v429_v23  ;;  %v502_v28 = vsub.f32 %v1573_v17, %v501_v24  ;;  %873 = vmatpush.msrb.mxu0 %v573_v22  ;;  %v437_v29 = vand.u32 4294901760, %v1585_v25  ;;  %v348_v22 = vld [vmem:[%s1547_s24 + $0x30] sm:$0xff]  ;;  %s1104_s18 = scalar_select %p1103_p1, 1.0, 2.0 }
  0x28   : > { %v510_v40 = vsub.f32 %v1578_v19, %v509_v35  ;;  %v445_v45 = vand.u32 4294901760, %v1606_v39  ;;  %v517_v48 = vand.u32 4294901760, %v1613_v41  ;;  %v1621_v49 = vand.u32 4294901760, %v399_v43  ;;  %s302_s19 = scalar_lea.vmem [#allocation5], %s1251_s1  ;;  %s1373_s1 = scalar_lea.hbm %s1915_s6, 16 }
  0x29   : > { %v575_v32 = vand.u32 4294901760, %v574_v26  ;;  %v431_v33 = vand.u32 4294901760, %v430_v27  ;;  %v503_v34 = vand.u32 4294901760, %v502_v28  ;;  %v438_v38 = vsub.f32 %v1585_v25, %v437_v29  ;;  %v357_v27 = vld [vmem:[%s1547_s24 + $0x78] sm:$0xff]  ;;  %s1123_s20 = sshll.u32 %s302_s19, 4  ;;  %s1124_s20 = int_to_ptr.vmem [resolvable:$true] %s1123_s20 }
  0x2a   : > { %v511_v47 = vand.u32 4294901760, %v510_v40  ;;  %v446_v52 = vsub.f32 %v1606_v39, %v445_v45  ;;  %v1630_v53 = vsub.f32 %v372_v42, %v1618_v46  ;;  %v518_v54 = vsub.f32 %v1613_v41, %v517_v48 }
  0x2b   : > { %1263 = vmatpush.msra.mxu2 %v575_v32  ;;  %576 = vmatpush.msra.mxu1 %v575_v32  ;;  %v439_v44 = vand.u32 4294901760, %v438_v38  ;;  %v1637_v55 = vsub.f32 %v399_v43, %v1621_v49  ;;  %v375_v56 = vsel %vm361_vm0, %v346_v50, 0  ;;  %v402_v57 = vsel %vm361_vm0, %v355_v51, 0  ;;  %v349_v50 = vld [vmem:[%s1547_s24 + $0x38] sm:$0xff]  ;;  %s1109_s24 = scalar_lea.sflag [#allocation6], %s300_s21 }
  0x2c   : > { %614 = vmatmul.f32.vlgmr.msra.gmra.mxu2 %v1560_v9  ;;  %432 = vmatmul.f32.vlgmr.msra.gmra.mxu0 %v431_v33  ;;  %v447_v58 = vand.u32 4294901760, %v446_v52  ;;  %v453_v59 = vand.u32 4294901760, %v1630_v53  ;;  %v1642_v60 = vand.u32 4294901760, %v375_v56  ;;  %v519_v61 = vand.u32 4294901760, %v518_v54 }
  0x2d   : > { %578 = vmatmul.f32.vlgmr.msra.gmra.mxu1 %v1562_v10  ;;  %504 = vmatmul.f32.vlgmr.msra.gmra.mxu3 %v503_v34  ;;  %v525_v62 = vand.u32 4294901760, %v1637_v55  ;;  %v1645_v63 = vand.u32 4294901760, %v402_v57  ;;  %v378_v6 = vsel %vm361_vm0, %v347_v0, 0  ;;  %v405_v7 = vsel %vm361_vm0, %v356_v1, 0 }
  0x2e   : > { %659 = vmatpush.msrb.mxu2 %v572_v15  ;;  %955 = vmatpush.msrb.mxu1 %v425_v8  ;;  %v454_v2 = vsub.f32 %v1630_v53, %v453_v59  ;;  %v1654_v3 = vsub.f32 %v375_v56, %v1642_v60  ;;  %v1666_v13 = vand.u32 4294901760, %v378_v6  ;;  %v1669_v20 = vand.u32 4294901760, %v405_v7 }
  0x2f   : > { %v526_v4 = vsub.f32 %v1637_v55, %v525_v62  ;;  %v1661_v5 = vsub.f32 %v402_v57, %v1645_v63  ;;  %v387_v26 = vsel %vm361_vm0, %v350_v21, 0  ;;  %v381_v36 = vsel %vm361_vm0, %v348_v22, 0 }
  0x30   : > { %v455_v8 = vand.u32 4294901760, %v454_v2  ;;  %v461_v12 = vand.u32 4294901760, %v1654_v3  ;;  %v1680_v32 = vsub.f32 %v378_v6, %v1666_v13  ;;  %v1687_v34 = vsub.f32 %v405_v7, %v1669_v20 }
  0x31   : > { %v527_v14 = vand.u32 4294901760, %v526_v4  ;;  %v533_v15 = vand.u32 4294901760, %v1661_v5  ;;  %v408_v37 = vsel %vm361_vm0, %v357_v27, 0  ;;  %v1692_v42 = vand.u32 4294901760, %v381_v36 }
  0x32   : > { %v462_v28 = vsub.f32 %v1654_v3, %v461_v12  ;;  %v469_v40 = vand.u32 4294901760, %v1680_v32  ;;  %v384_v57 = vsel %vm361_vm0, %v349_v50, 0  ;;  %v491_v21 = vand.u32 4294901760, %v387_v26 }
  0x33   : > { %v534_v33 = vsub.f32 %v1661_v5, %v533_v15  ;;  %v476_v52 = vsub.f32 %v381_v36, %v1692_v42  ;;  %v1709_v0 = vand.u32 4294901760, %v384_v57 }
  0x34   : > { %618 = vmatmul.f32.gmra.mxu2 %v1564_v11  ;;  %440 = vmatmul.f32.gmra.mxu0 %v439_v44  ;;  %v463_v38 = vand.u32 4294901760, %v462_v28  ;;  %v541_v44 = vand.u32 4294901760, %v1687_v34  ;;  %v470_v51 = vsub.f32 %v1680_v32, %v469_v40  ;;  %v492_v28 = vsub.f32 %v387_v26, %v491_v21 }
  0x35   : > { %582 = vmatmul.f32.gmra.mxu1 %v1575_v18  ;;  %512 = vmatmul.f32.gmra.mxu3 %v511_v47  ;;  %v535_v43 = vand.u32 4294901760, %v534_v33  ;;  %v1695_v47 = vand.u32 4294901760, %v408_v37  ;;  %v484_v6 = vsub.f32 %v384_v57, %v1709_v0 }
  0x36   : > { %v542_v54 = vsub.f32 %v1687_v34, %v541_v44  ;;  %v493_v36 = vand.u32 4294901760, %v492_v28 }
  0x37   : > { %v1706_v56 = vsub.f32 %v408_v37, %v1695_v47 }
  0x38   : > { %v543_v1 = vand.u32 4294901760, %v542_v54  ;;  %v494_v37 = vsub.f32 %v492_v28, %v493_v36 }
  0x39   : > { %v549_v2 = vand.u32 4294901760, %v1706_v56 }
  0x3b   : > { %v550_v7 = vsub.f32 %v1706_v56, %v549_v2 }
  0x3c   : > { %622 = vmatmul.f32.gmra.mxu2 %v1594_v30  ;;  %448 = vmatmul.f32.gmra.mxu0 %v447_v58  ;;  %v471_v58 = vand.u32 4294901760, %v470_v51 }
  0x3d   : > { %586 = vmatmul.f32.gmra.mxu1 %v1596_v31  ;;  %520 = vmatmul.f32.gmra.mxu3 %v519_v61  ;;  %v477_v61 = vand.u32 4294901760, %v476_v52  ;;  %v551_v22 = vand.u32 4294901760, %v550_v7 }
  0x3f   : > { %v478_v4 = vsub.f32 %v476_v52, %v477_v61 }
  0x44   : > { %626 = vmatmul.f32.gmra.mxu2 %v1621_v49  ;;  %456 = vmatmul.f32.gmra.mxu0 %v455_v8  ;;  %v479_v8 = vand.u32 4294901760, %v478_v4 }
  0x45   : > { %590 = vmatmul.f32.gmra.mxu1 %v1618_v46  ;;  %528 = vmatmul.f32.gmra.mxu3 %v527_v14  ;;  %v485_v14 = vand.u32 4294901760, %v484_v6 }
  0x47   : > { %v486_v27 = vsub.f32 %v484_v6, %v485_v14 }
  0x49   : > { %v487_v33 = vand.u32 4294901760, %v486_v27 }
  0x4c   : > { %630 = vmatmul.f32.gmra.mxu2 %v1645_v63  ;;  %464 = vmatmul.f32.gmra.mxu0 %v463_v38  ;;  %v495_v38 = vand.u32 4294901760, %v494_v37 }
  0x4d   : > { %594 = vmatmul.f32.gmra.mxu1 %v1642_v60  ;;  %536 = vmatmul.f32.gmra.mxu3 %v535_v43 }
  0x54   : > { %634 = vmatmul.f32.gmra.mxu2 %v1669_v20  ;;  %472 = vmatmul.f32.gmra.mxu0 %v471_v58 }
  0x55   : > { %598 = vmatmul.f32.gmra.mxu1 %v1666_v13  ;;  %544 = vmatmul.f32.gmra.mxu3 %v543_v1 }
  0x5c   : > { %638 = vmatmul.f32.gmra.mxu2 %v1695_v47  ;;  %480 = vmatmul.f32.gmra.mxu0 %v479_v8 }
  0x5d   : > { %602 = vmatmul.f32.gmra.mxu1 %v1692_v42  ;;  %552 = vmatmul.f32.gmra.mxu3 %v551_v22 }
  0x64   : > { %662 = vmatmul.f32.vlgmr.msrb.gmra.mxu2 %v1570_v16  ;;  %488 = vmatmul.f32.gmra.mxu0 %v487_v33 }
  0x65   : > { %606 = vmatmul.f32.gmra.mxu1 %v1709_v0  ;;  %761 = vmatmul.f32.vlgmr.msrb.gmra.mxu3 %v429_v23 }
  0x6c   : > { %667 = vmatmul.f32.gmra.mxu2 %v1585_v25  ;;  %496 = vmatmul.f32.gmra.mxu0 %v495_v38 }
  0x6d   : > { %610 = vmatmul.f32.gmra.mxu1 %v491_v21  ;;  %767 = vmatmul.f32.gmra.mxu3 %v437_v29 }
  0x74   : > { %672 = vmatmul.f32.gmra.mxu2 %v1606_v39  ;;  %875 = vmatmul.f32.vlgmr.msrb.gmra.mxu0 %v1562_v10 }
  0x75   : > { %773 = vmatmul.f32.gmra.mxu3 %v445_v45  ;;  %957 = vmatmul.f32.vlgmr.msrb.gmra.mxu1 %v1562_v10 }
  0x7c   : > { %677 = vmatmul.f32.gmra.mxu2 %v1630_v53  ;;  %879 = vmatmul.f32.gmra.mxu0 %v1575_v18 }
  0x7d   : > { %779 = vmatmul.f32.gmra.mxu3 %v453_v59  ;;  %961 = vmatmul.f32.gmra.mxu1 %v1575_v18 }
  0x84   : > { %682 = vmatmul.f32.gmra.mxu2 %v1654_v3  ;;  %883 = vmatmul.f32.gmra.mxu0 %v1596_v31 }
  0x85   : > { %785 = vmatmul.f32.gmra.mxu3 %v461_v12  ;;  %965 = vmatmul.f32.gmra.mxu1 %v1596_v31 }
  0x8c   : > { %687 = vmatmul.f32.gmra.mxu2 %v1680_v32  ;;  %887 = vmatmul.f32.gmra.mxu0 %v1618_v46 }
  0x8d   : > { %791 = vmatmul.f32.gmra.mxu3 %v469_v40  ;;  %969 = vmatmul.f32.gmra.mxu1 %v1618_v46 }
  0x94   : > { %692 = vmatmul.f32.gmra.mxu2 %v476_v52  ;;  %891 = vmatmul.f32.gmra.mxu0 %v1642_v60 }
  0x95   : > { %797 = vmatmul.f32.gmra.mxu3 %v477_v61  ;;  %973 = vmatmul.f32.gmra.mxu1 %v1642_v60 }
  0x9c   : > { %697 = vmatmul.f32.gmra.mxu2 %v484_v6  ;;  %895 = vmatmul.f32.gmra.mxu0 %v1666_v13 }
  0x9d   : > { %803 = vmatmul.f32.gmra.mxu3 %v485_v14  ;;  %977 = vmatmul.f32.gmra.mxu1 %v1666_v13 }
  0xa4   : > { %702 = vmatmul.f32.gmra.mxu2 %v492_v28  ;;  %899 = vmatmul.f32.gmra.mxu0 %v1692_v42 }
  0xa5   : > { %809 = vmatmul.f32.gmra.mxu3 %v493_v36  ;;  %981 = vmatmul.f32.gmra.mxu1 %v1692_v42 }
  0xa9   : > { %v1751_v10 = vpop.f32.mrf.mxu0 }
  0xaa   : > { %v1753_v16 = vpop.f32.mrf.mxu1 }
  0xac   : > { %707 = vmatmul.f32.gmra.mxu2 %v1573_v17  ;;  %903 = vmatmul.f32.gmra.mxu0 %v1709_v0 }
  0xad   : > { %815 = vmatmul.f32.gmra.mxu3 %v501_v24  ;;  %985 = vmatmul.f32.gmra.mxu1 %v1709_v0  ;;  %v580_v0 = vadd.f32 %v1753_v16, %v1751_v10 }
  0xaf   : > { %v615_v18 = vpop.f32.mrf.mxu2 }
  0xb0   : > { %v505_v23 = vpop.f32.mrf.mxu3 }
  0xb1   : > { %v1760_v25 = vadd.f32 %v615_v18, %v505_v23  ;;  %v441_v29 = vpop.f32.mrf.mxu0 }
  0xb2   : > { %v583_v31 = vpop.f32.mrf.mxu1 }
  0xb3   : > { %v1762_v39 = vadd.f32 %v583_v31, %v441_v29 }
  0xb4   : > { %712 = vmatmul.f32.gmra.mxu2 %v1578_v19  ;;  %907 = vmatmul.f32.gmra.mxu0 %v491_v21 }
  0xb5   : > { %821 = vmatmul.f32.gmra.mxu3 %v509_v35  ;;  %989 = vmatmul.f32.gmra.mxu1 %v491_v21 }
  0xb7   : > { %v619_v45 = vpop.f32.mrf.mxu2 }
  0xb8   : > { %v513_v17 = vpop.f32.mrf.mxu3 }
  0xb9   : > { %v1767_v24 = vadd.f32 %v619_v45, %v513_v17  ;;  %v449_v46 = vpop.f32.mrf.mxu0 }
  0xba   : > { %v587_v53 = vpop.f32.mrf.mxu1 }
  0xbb   : > { %v1769_v59 = vadd.f32 %v587_v53, %v449_v46 }
  0xbc   : > { %717 = vmatmul.f32.gmra.mxu2 %v1613_v41  ;;  %911 = vmatmul.f32.gmra.mxu0 %v1560_v9 }
  0xbd   : > { %827 = vmatmul.f32.gmra.mxu3 %v517_v48  ;;  %993 = vmatmul.f32.gmra.mxu1 %v1560_v9 }
  0xbf   : > { %v623_v19 = vpop.f32.mrf.mxu2 }
  0xc0   : > { %v521_v35 = vpop.f32.mrf.mxu3 }
  0xc1   : > { %v1776_v60 = vadd.f32 %v623_v19, %v521_v35  ;;  %v457_v3 = vpop.f32.mrf.mxu0 }
  0xc2   : > { %v591_v12 = vpop.f32.mrf.mxu1 }
  0xc3   : > { %v1778_v13 = vadd.f32 %v591_v12, %v457_v3 }
  0xc4   : > { %722 = vmatmul.f32.gmra.mxu2 %v1637_v55  ;;  %915 = vmatmul.f32.gmra.mxu0 %v1564_v11 }
  0xc5   : > { %833 = vmatmul.f32.gmra.mxu3 %v525_v62  ;;  %997 = vmatmul.f32.gmra.mxu1 %v1564_v11 }
  0xc7   : > { %v627_v41 = vpop.f32.mrf.mxu2 }
  0xc8   : > { %v529_v48 = vpop.f32.mrf.mxu3 }
  0xc9   : > { %v1785_v9 = vadd.f32 %v627_v41, %v529_v48  ;;  %v465_v26 = vpop.f32.mrf.mxu0 }
  0xca   : > { %v595_v32 = vpop.f32.mrf.mxu1 }
  0xcb   : > { %v1787_v40 = vadd.f32 %v595_v32, %v465_v26 }
  0xcc   : > { %727 = vmatmul.f32.gmra.mxu2 %v1661_v5  ;;  %919 = vmatmul.f32.gmra.mxu0 %v1594_v30 }
  0xcd   : > { %839 = vmatmul.f32.gmra.mxu3 %v533_v15  ;;  %1001 = vmatmul.f32.gmra.mxu1 %v1594_v30 }
  0xcf   : > { %v631_v55 = vpop.f32.mrf.mxu2 }
  0xd0   : > { %v537_v62 = vpop.f32.mrf.mxu3 }
  0xd1   : > { %v1794_v11 = vadd.f32 %v631_v55, %v537_v62  ;;  %v473_v42 = vpop.f32.mrf.mxu0 }
  0xd2   : > { %v599_v43 = vpop.f32.mrf.mxu1 }
  0xd3   : > { %v1796_v50 = vadd.f32 %v599_v43, %v473_v42 }
  0xd4   : > { %732 = vmatmul.f32.gmra.mxu2 %v1687_v34  ;;  %923 = vmatmul.f32.gmra.mxu0 %v1621_v49 }
  0xd5   : > { %845 = vmatmul.f32.gmra.mxu3 %v541_v44  ;;  %1005 = vmatmul.f32.gmra.mxu1 %v1621_v49 }
  0xd7   : > { %v635_v5 = vpop.f32.mrf.mxu2 }
  0xd8   : > { %v545_v15 = vpop.f32.mrf.mxu3 }
  0xd9   : > { %v1803_v30 = vadd.f32 %v635_v5, %v545_v15  ;;  %v481_v51 = vpop.f32.mrf.mxu0 }
  0xda   : > { %v603_v52 = vpop.f32.mrf.mxu1 }
  0xdb   : > { %v1805_v54 = vadd.f32 %v603_v52, %v481_v51 }
  0xdc   : > { %737 = vmatmul.f32.gmra.mxu2 %v1706_v56  ;;  %927 = vmatmul.f32.gmra.mxu0 %v1645_v63 }
  0xdd   : > { %851 = vmatmul.f32.gmra.mxu3 %v549_v2  ;;  %1009 = vmatmul.f32.gmra.mxu1 %v1645_v63 }
  0xdf   : > { %v639_v34 = vpop.f32.mrf.mxu2 }
  0xe0   : > { %v553_v44 = vpop.f32.mrf.mxu3 }
  0xe1   : > { %v1812_v49 = vadd.f32 %v639_v34, %v553_v44  ;;  %v489_v57 = vpop.f32.mrf.mxu0 }
  0xe2   : > { %v607_v58 = vpop.f32.mrf.mxu1 }
  0xe3   : > { %v608_v61 = vadd.f32 %v607_v58, %v489_v57 }
  0xe4   : > { %931 = vmatmul.f32.gmra.mxu0 %v1669_v20 }
  0xe5   : > { %1013 = vmatmul.f32.gmra.mxu1 %v1669_v20 }
  0xe7   : > { %v663_v1 = vpop.f32.mrf.mxu2 }
  0xe8   : > { %v664_v4 = vadd.f32 %v663_v1, %v580_v0  ;;  %v762_v56 = vpop.f32.mrf.mxu3 }
  0xe9   : > { %v497_v2 = vpop.f32.mrf.mxu0 }
  0xea   : > { %v763_v6 = vadd.f32 %v762_v56, %v664_v4  ;;  %v611_v63 = vpop.f32.mrf.mxu1 }
  0xeb   : > { %v612_v7 = vadd.f32 %v611_v63, %v497_v2 }
  0xec   : > { %935 = vmatmul.f32.gmra.mxu0 %v1695_v47 }
  0xed   : > { %1017 = vmatmul.f32.gmra.mxu1 %v1695_v47 }
  0xef   : > { %v668_v8 = vpop.f32.mrf.mxu2 }
  0xf0   : > { %v669_v14 = vadd.f32 %v668_v8, %v1762_v39  ;;  %v768_v21 = vpop.f32.mrf.mxu3 }
  0xf1   : > { %v876_v22 = vpop.f32.mrf.mxu0 }
  0xf2   : > { %v769_v20 = vadd.f32 %v768_v21, %v669_v14  ;;  %v877_v27 = vadd.f32 %v876_v22, %v763_v6  ;;  %v958_v28 = vpop.f32.mrf.mxu1 }
  0xf4   : > { %v1821_v33 = vadd.f32 %v958_v28, %v877_v27 }
  0xf7   : > { %v673_v36 = vpop.f32.mrf.mxu2 }
  0xf8   : > { %v674_v37 = vadd.f32 %v673_v36, %v1769_v59  ;;  %v774_v38 = vpop.f32.mrf.mxu3 }
  0xf9   : > { %v880_v10 = vpop.f32.mrf.mxu0 }
  0xfa   : > { %v775_v16 = vadd.f32 %v774_v38, %v674_v37  ;;  %v881_v18 = vadd.f32 %v880_v10, %v769_v20  ;;  %v962_v23 = vpop.f32.mrf.mxu1 }
  0xfc   : > { %v1824_v29 = vadd.f32 %v962_v23, %v881_v18 }
  0xff   : > { %v678_v47 = vpop.f32.mrf.mxu2 }
 0x100   : > { %v679_v31 = vadd.f32 %v678_v47, %v1778_v13  ;;  %v780_v39 = vpop.f32.mrf.mxu3 }
 0x101   : > { %v884_v45 = vpop.f32.mrf.mxu0 }
 0x102   : > { %v781_v17 = vadd.f32 %v780_v39, %v679_v31  ;;  %v885_v46 = vadd.f32 %v884_v45, %v775_v16  ;;  %v966_v53 = vpop.f32.mrf.mxu1 }
 0x104   : > { %v1827_v19 = vadd.f32 %v966_v53, %v885_v46 }
 0x107   : > { %v683_v35 = vpop.f32.mrf.mxu2 }
 0x108   : > { %v684_v59 = vadd.f32 %v683_v35, %v1787_v40  ;;  %v786_v3 = vpop.f32.mrf.mxu3 }
 0x109   : > { %v888_v12 = vpop.f32.mrf.mxu0 }
 0x10a   : > { %v787_v41 = vadd.f32 %v786_v3, %v684_v59  ;;  %v889_v48 = vadd.f32 %v888_v12, %v781_v17  ;;  %v970_v26 = vpop.f32.mrf.mxu1 }
 0x10c   : > { %v1830_v32 = vadd.f32 %v970_v26, %v889_v48 }
 0x10f   : > { %v688_v55 = vpop.f32.mrf.mxu2 }
 0x110   : > { %v689_v13 = vadd.f32 %v688_v55, %v1796_v50  ;;  %v792_v62 = vpop.f32.mrf.mxu3 }
 0x111   : > { %v892_v42 = vpop.f32.mrf.mxu0 }
 0x112   : > { %v793_v43 = vadd.f32 %v792_v62, %v689_v13  ;;  %v893_v5 = vadd.f32 %v892_v42, %v787_v41  ;;  %v974_v15 = vpop.f32.mrf.mxu1 }
 0x114   : > { %v1833_v51 = vadd.f32 %v974_v15, %v893_v5 }
 0x117   : > { %v693_v52 = vpop.f32.mrf.mxu2 }
 0x118   : > { %v694_v40 = vadd.f32 %v693_v52, %v1805_v54  ;;  %v798_v34 = vpop.f32.mrf.mxu3 }
 0x119   : > { %v896_v44 = vpop.f32.mrf.mxu0 }
 0x11a   : > { %v799_v57 = vadd.f32 %v798_v34, %v694_v40  ;;  %v897_v58 = vadd.f32 %v896_v44, %v793_v43  ;;  %v978_v0 = vpop.f32.mrf.mxu1 }
 0x11c   : > { %v1836_v1 = vadd.f32 %v978_v0, %v897_v58 }
 0x11f   : > { %v698_v4 = vpop.f32.mrf.mxu2 }
 0x120   : > { %v699_v56 = vadd.f32 %v698_v4, %v608_v61  ;;  %v804_v50 = vpop.f32.mrf.mxu3 }
 0x121   : > { %v900_v2 = vpop.f32.mrf.mxu0 }
 0x122   : > { %v805_v6 = vadd.f32 %v804_v50, %v699_v56  ;;  %v901_v63 = vadd.f32 %v900_v2, %v799_v57  ;;  %v982_v8 = vpop.f32.mrf.mxu1 }
 0x124   : > { %v1838_v14 = vadd.f32 %v982_v8, %v901_v63 }
 0x127   : > { %v703_v21 = vpop.f32.mrf.mxu2 }
 0x128   : > { %v704_v22 = vadd.f32 %v703_v21, %v612_v7  ;;  %v810_v20 = vpop.f32.mrf.mxu3 }
 0x129   : > { %v904_v54 = vpop.f32.mrf.mxu0 }
 0x12a   : > { %v811_v27 = vadd.f32 %v810_v20, %v704_v22  ;;  %v905_v28 = vadd.f32 %v904_v54, %v805_v6  ;;  %v986_v36 = vpop.f32.mrf.mxu1 }
 0x12c   : > { %v1840_v37 = vadd.f32 %v986_v36, %v905_v28 }
 0x12f   : > { %v708_v38 = vpop.f32.mrf.mxu2 }
 0x130   : > { %v816_v10 = vpop.f32.mrf.mxu3 }
 0x131   : > { %v908_v16 = vpop.f32.mrf.mxu0 }
 0x132   : > { %v909_v61 = vadd.f32 %v908_v16, %v811_v27  ;;  %v990_v18 = vpop.f32.mrf.mxu1 }
 0x134   : > { %v1842_v23 = vadd.f32 %v990_v18, %v909_v61 }
 0x137   : > { %v713_v47 = vpop.f32.mrf.mxu2 }
 0x138   : > { %v822_v31 = vpop.f32.mrf.mxu3  ;;  %v714_v2 = vadd.f32 %v713_v47, %v1767_v24 }
 0x139   : > { %v912_v39 = vpop.f32.mrf.mxu0 }
 0x13a   : > { %v994_v45 = vpop.f32.mrf.mxu1  ;;  %v823_v20 = vadd.f32 %v822_v31, %v714_v2 }
 0x13f   : > { %v718_v17 = vpop.f32.mrf.mxu2 }
 0x140   : > { %v828_v7 = vpop.f32.mrf.mxu3  ;;  %v719_v58 = vadd.f32 %v718_v17, %v1776_v60 }
 0x141   : > { %v916_v46 = vpop.f32.mrf.mxu0 }
 0x142   : > { %v998_v53 = vpop.f32.mrf.mxu1 }
 0x147   : > { %v723_v35 = vpop.f32.mrf.mxu2 }
 0x148   : > { %v834_v59 = vpop.f32.mrf.mxu3  ;;  %v724_v34 = vadd.f32 %v723_v35, %v1785_v9 }
 0x149   : > { %v920_v3 = vpop.f32.mrf.mxu0 }
 0x14a   : > { %v1002_v12 = vpop.f32.mrf.mxu1  ;;  %v835_v6 = vadd.f32 %v834_v59, %v724_v34 }
 0x14f   : > { %v728_v41 = vpop.f32.mrf.mxu2 }
 0x150   : > { %v840_v48 = vpop.f32.mrf.mxu3  ;;  %v729_v15 = vadd.f32 %v728_v41, %v1794_v11  ;;  %v829_v11 = vadd.f32 %v828_v7, %v719_v58 }
 0x151   : > { %v924_v26 = vpop.f32.mrf.mxu0 }
 0x152   : > { %v1006_v55 = vpop.f32.mrf.mxu1  ;;  %v841_v0 = vadd.f32 %v840_v48, %v729_v15  ;;  %v925_v8 = vadd.f32 %v924_v26, %v835_v6  ;;  %v921_v54 = vadd.f32 %v920_v3, %v829_v11  ;;  %v1026_v15 = vmin.f32 %v1836_v1, 0.0 }
 0x153   : > { %v1023_v1 = vmin.f32 %v1827_v19, 0.0 }
 0x154   : > { %v1007_v16 = vadd.f32 %v1006_v55, %v925_v8  ;;  %v1003_v47 = vadd.f32 %v1002_v12, %v921_v54  ;;  %v359_v8 = vld [vmem:[%s331_s22] sm:$0xf]  ;;  %s1125_s22 = sshll.u32 %s1121_s17, 4  ;;  %s1126_s22 = int_to_ptr.hbm [resolvable:$true] %s1125_s22 }
 0x156   : > { %v1032_v48 = vmin.f32 %v1003_v47, 0.0 }
 0x157   : > { %v733_v13 = vpop.f32.mrf.mxu2 }
 0x158   : > { %v846_v43 = vpop.f32.mrf.mxu3  ;;  %v734_v5 = vadd.f32 %v733_v13, %v1803_v30  ;;  %v709_v30 = vadd.f32 %v708_v38, %v1760_v25  ;;  %v1033_v38 = vmin.f32 %v1007_v16, 0.0  ;;  %v1028_v13 = vmin.f32 %v1840_v37, 0.0 }
 0x159   : > { %v928_v62 = vpop.f32.mrf.mxu0 }
 0x15a   : > { %v1010_v42 = vpop.f32.mrf.mxu1  ;;  %v847_v44 = vadd.f32 %v846_v43, %v734_v5  ;;  %v929_v63 = vadd.f32 %v928_v62, %v841_v0  ;;  %v817_v36 = vadd.f32 %v816_v10, %v709_v30  ;;  %v1061_v26 = vmul.f32 1.442695, %v1033_v38 }
 0x15c   : > { %v1011_v27 = vadd.f32 %v1010_v42, %v929_v63  ;;  %v913_v24 = vadd.f32 %v912_v39, %v817_v36  ;;  %v1029_v39 = vmin.f32 %v1842_v23, 0.0  ;;  %v1027_v42 = vmin.f32 %v1838_v14, 0.0 }
 0x15d   : > { %v1047_v14 = vmul.f32 1.442695, %v1026_v15 }
 0x15e   : > { %v1034_v17 = vmin.f32 %v1011_v27, 0.0  ;;  %v995_v41 = vadd.f32 %v994_v45, %v913_v24  ;;  %v1053_v43 = vmul.f32 1.442695, %v1029_v39  ;;  %v1049_v37 = vmul.f32 1.442695, %v1027_v42 }
 0x15f   : > { %v738_v52 = vpop.f32.mrf.mxu2 }
 0x160   : > { %v739_v4 = vadd.f32 %v738_v52, %v1812_v49  ;;  %v852_v50 = vpop.f32.mrf.mxu3  ;;  %v917_v49 = vadd.f32 %v916_v46, %v823_v20  ;;  %v1063_v31 = vmul.f32 1.442695, %v1034_v17  ;;  %v1030_v10 = vmin.f32 %v995_v41, 0.0 }
 0x161   : > { %v932_v40 = vpop.f32.mrf.mxu0  ;;  %v1059_v46 = vmul.f32 1.442695, %v1032_v48  ;;  %v1051_v52 = vmul.f32 1.442695, %v1028_v13 }
 0x162   : > { %v1014_v57 = vpop.f32.mrf.mxu1  ;;  %v933_v56 = vadd.f32 %v932_v40, %v847_v44  ;;  %v853_v21 = vadd.f32 %v852_v50, %v739_v4  ;;  %v999_v25 = vadd.f32 %v998_v53, %v917_v49  ;;  %v1055_v62 = vmul.f32 1.442695, %v1030_v10 }
 0x163   : > { %v1025_v40 = vmin.f32 %v1833_v51, 0.0  ;;  %v1024_v44 = vmin.f32 %v1830_v32, 0.0  ;;  %v1022_v51 = vmin.f32 %v1824_v29, 0.0  ;;  %v1021_v32 = vmin.f32 %v1821_v33, 0.0 }
 0x164   : > { %v1015_v22 = vadd.f32 %v1014_v57, %v933_v56  ;;  %v1031_v3 = vmin.f32 %v999_v25, 0.0  ;;  %v1041_v50 = vmul.f32 1.442695, %v1023_v1 }
 0x165   : > { %v1045_v58 = vmul.f32 1.442695, %v1025_v40  ;;  %v1043_v4 = vmul.f32 1.442695, %v1024_v44  ;;  %v1039_v19 = vmul.f32 1.442695, %v1022_v51 }
 0x166   : > { %v1035_v61 = vmin.f32 %v1015_v22, 0.0  ;;  %v1057_v12 = vmul.f32 1.442695, %v1031_v3  ;;  %v1037_v63 = vmul.f32 1.442695, %v1021_v32 }
 0x167   : > { %v360_v22 = vld [vmem:[%s340_s0] sm:$0xf]  ;;  %s1367_s0 = sshra.s32 %s1126_s22, 4  ;;  %s1368_s0 = int_to_ptr.hbm [resolvable:$true] %s1367_s0 }
 0x168   : > { %v1065_v7 = vmul.f32 1.442695, %v1035_v61  ;;  %s1369_s13 = scalar_lea.hbm %s1368_s0, 8  ;;  %p1374_p6 = scmp.lt.s32.totalorder %s1368_s0, %s1915_s6 }
 0x169   : > { %v936_v9 = vpop.f32.mrf.mxu0  ;;  %p1370_p2 = scmp.ne.s32.totalorder %s1368_s0, %s1369_s13  ;;  %p1375_p7 = scmp.lt.s32.totalorder %s1373_s1, %s1369_s13 }
 0x16a   : > { %v937_v60 = vadd.f32 %v936_v9, %v853_v21  ;;  %v1018_v28 = vpop.f32.mrf.mxu1 }
 0x16b   : > { %p1371_p3 = pnand %p1370_p2, %p1514_p4  ;;  %p1376_p9 = por %p1375_p7, %p1374_p6 }
 0x16c   : > { %v1019_v18 = vadd.f32 %v1018_v28, %v937_v60 }
 0x16d   : > { %p1372_p5 = pneg %p1371_p3 }
 0x16e   : > { %v1036_v35 = vmin.f32 %v1019_v18, 0.0 }
 0x16f   : > { %p1377_p10 = pnand %p1376_p9, %p1372_p5 }
 0x170   : > { %v1067_v59 = vmul.f32 1.442695, %v1036_v35 }
 0x172   : > { %1321 = vpow2.f32 %v1067_v59 }
 0x173   : > { %1323 = vpow2.f32 %v1065_v7 }
 0x174   : > { %1325 = vpow2.f32 %v1063_v31 }
 0x175   : > { %1327 = vpow2.f32 %v1061_v26 }
 0x176   : > { %1329 = vpow2.f32 %v1059_v46 }
 0x177   : > { %1331 = vpow2.f32 %v1057_v12 }
 0x178   : > { %v1322_v55 = vpop.eup %1321  ;;  %1333 = vpow2.f32 %v1055_v62 }
 0x179   : > { %1069 = vmatpush.msra.mxu2 %v1322_v55  ;;  %v1324_v53 = vpop.eup %1323  ;;  %1335 = vpow2.f32 %v1053_v43 }
 0x17a   : > { %v1326_v45 = vpop.eup %1325  ;;  %1337 = vpow2.f32 %v1051_v52 }
 0x17b   : > { %1070 = vmatpush.msra.mxu2 %v1324_v53  ;;  %v1328_v5 = vpop.eup %1327  ;;  %1339 = vpow2.f32 %v1049_v37 }
 0x17c   : > { %v1330_v23 = vpop.eup %1329  ;;  %1341 = vpow2.f32 %v1047_v14 }
 0x17d   : > { %1071 = vmatpush.msra.mxu2 %v1326_v45  ;;  %v1332_v34 = vpop.eup %1331  ;;  %1343 = vpow2.f32 %v1045_v58 }
 0x17e   : > { %v1334_v57 = vpop.eup %1333  ;;  %1345 = vpow2.f32 %v1043_v4 }
 0x17f   : > { %1072 = vmatpush.msra.mxu2 %v1328_v5  ;;  %v1336_v0 = vpop.eup %1335  ;;  %1347 = vpow2.f32 %v1041_v50 }
 0x180   : > { %v1338_v56 = vpop.eup %1337  ;;  %1349 = vpow2.f32 %v1039_v19 }
 0x181   : > { %1073 = vmatpush.msra.mxu2 %v1330_v23  ;;  %v1340_v2 = vpop.eup %1339  ;;  %1351 = vpow2.f32 %v1037_v63 }
 0x182   : > { %v1342_v6 = vpop.eup %1341 }
 0x183   : > { %1074 = vmatpush.msra.mxu2 %v1332_v34  ;;  %v1344_v29 = vpop.eup %1343 }
 0x184   : > { %v1346_v30 = vpop.eup %1345 }
 0x185   : > { %1075 = vmatpush.msra.mxu2 %v1334_v57  ;;  %v1348_v33 = vpop.eup %1347 }
 0x186   : > { %v1350_v11 = vpop.eup %1349 }
 0x187   : > { %1076 = vmatpush.msra.mxu2 %v1336_v0  ;;  %v1352_v21 = vpop.eup %1351 }
 0x189   : > { %1077 = vmatpush.msra.mxu2 %v1338_v56 }
 0x18b   : > { %1078 = vmatpush.msra.mxu2 %v1340_v2 }
 0x18d   : > { %1079 = vmatpush.msra.mxu2 %v1342_v6 }
 0x18f   : > { %1080 = vmatpush.msra.mxu2 %v1344_v29 }
 0x191   : > { %1081 = vmatpush.msra.mxu2 %v1346_v30 }
 0x193   : > { %1082 = vmatpush.msra.mxu2 %v1348_v33 }
 0x195   : > { %1083 = vmatpush.msra.mxu2 %v1350_v11 }
 0x197   : > { %1084 = vmatpush.msra.mxu2 %v1352_v21 }
 0x198   : > { %1085 = vmatmul.f32.vlgmr.msra.gmra.mxu2 %v359_v8 }
 0x21b   : > { %v1086_v9 = vpop.f32.mrf.mxu2 }
 0x21c   : > { %v1089_v20 = vmul.f32 %v1086_v9, %v360_v22 }
 0x21e   : > { %v1091_v54 = vsel %vm1090_vm1, %v1089_v20, 0.0 }
 0x21f   : > { %1092 = vadd.xlane.f32.xlu0 %v1091_v54 }
 0x292   : > { %v1093_v27 = vpop.xlane.xlu0 %1092 }
 0x293   : > { %v1094_v60 = vrot.slane %v1093_v27, 4 }
 0x295   : > { %v1095_v28 = vadd.f32 %v1094_v60, %v1093_v27 }
 0x297   : > { %v1096_v36 = vrot.slane %v1095_v28, 2 }
 0x299   : > { %v1097_v49 = vadd.f32 %v1096_v36, %v1095_v28 }
 0x29b   : > { %v1098_v16 = vrot.slane %v1097_v49, 1 }
 0x29d   : > { %v1099_v61 = vadd.f32 %v1098_v16, %v1097_v49 }
 0x29f   : > { %1264 = vpush %v1099_v61 }
 0x2d0   : > { %s1265_s15 = spop %1264 }
 0x2d1   : > { %s1105_s23 = smul.f32 %s1265_s15, %s1104_s18 }
 0x2d3   : > { %v1106_v18 = vstv %s1105_s23 }
 0x2d4   : > { %1107 = vst [vmem:[%s302_s19] sm:$0xff] %v1106_v18 }
 0x2d5   : > { %1380 = shalt.err (!%p1377_p10)
}
 0x2d6   : > { %1266 = dma.vmem_to_hbm [thread:$0]  (%p1514_p4), %s1124_s20, 128, %s1126_s22, %s1109_s24  }
 0x2d7 PF: > { %p1272_p11 = scmp.ge.s32.totalorder %s1431_s30, 2  ;;  %s1137_s21 = sand.u32 1, %s1411_s25  }
 0x2d8   : > { %s1138_s16 = scalar_lea.sflag [#allocation6], %s1137_s21 }
 0x2d9   : > { %p1269_p12 = pnand %p1272_p11, %p1521_p8 }
 0x2db   : > { %p1270_p13 = pneg %p1269_p12 }
 0x2dd   : > { %1406 = dma.done.wait (%p1270_p13), %s1138_s16, 128  }
 0x2de   : > { %1408 = vsyncadd (%p1270_p13), %s1138_s16, 4294967168  ;;  %s21_s30 = sadd.s32 1, %s1431_s30   ;;  %s1918_s25 = smov %s1415_s26 }
 0x2df   : > { %p18_p0 = scmp.ge.s32.totalorder %s21_s30, 4   ;;  %s1919_s26 = smov %s1419_s27 }
 0x2e0   : > { %s1920_s27 = smov %s1527_s12  ;;  %s1921_s28 = smov %s1427_s29 }
 0x2e1   : > { %s1922_s29 = smov %s1924_s7  ;;  %20 = sbr.rel (!%p18_p0) target bundleno = 7 (0x7), region = 80 }
 0x2e6   :  { %1144 = vsyncpa [#allocation6], 1 }
 0x2e7   :  { %1146 = vsyncpa [#allocation6 + $0x1], 1 }

</bundles_post_ra>
